<compile_context>
chip_gen: v6e
topology: v6e:2x2x1
jax: 0.10.0
libtpu: 0.0.40
codegen_flags: <defaults>
</compile_context>

<pallas_src>
import functools

import jax
import jax.numpy as jnp
from jax.experimental import pallas as pl
from jax.experimental.pallas import tpu as pltpu

LANE = 128


def _round_up(x, m):
    return ((x + m - 1) // m) * m


def _pad2(a, rows, cols):
    return jnp.pad(a, ((0, rows - a.shape[0]), (0, cols - a.shape[1])))


# ----------------------------- Pallas kernels -----------------------------

def xw_kernel(x_ref, w_ref, o_ref):
    """Per-row-tile XW = X @ W' (BN scale already folded into W')."""
    o_ref[...] = jnp.dot(x_ref[...], w_ref[...],
                         preferred_element_type=jnp.float32).astype(o_ref.dtype)


def xw_matmul(x_bf16, w_bf16, *, tm):
    n_pad, f_in = x_bf16.shape
    f_out = w_bf16.shape[1]
    return pl.pallas_call(
        xw_kernel,
        out_shape=jax.ShapeDtypeStruct((n_pad, f_out), jnp.bfloat16),
        grid=(n_pad // tm,),
        in_specs=[
            pl.BlockSpec((tm, f_in), lambda i: (i, 0)),       # X row tile
            pl.BlockSpec((f_in, f_out), lambda i: (0, 0)),    # W' (resident)
        ],
        out_specs=pl.BlockSpec((tm, f_out), lambda i: (i, 0)),
        compiler_params=pltpu.CompilerParams(
            dimension_semantics=("parallel",)),
    )(x_bf16, w_bf16)


def agg_kernel(a_ref, xw_ref, shift_ref, o_ref, acc_ref, *,
               apply_relu: bool, apply_log_softmax: bool, valid_out: int):
    """Tiled y = A_hat @ XW, accumulated over k tiles; fused epilogue at the last k:
         y = acc + shift'            (bias*scale + BN shift, pre-folded)
         y = relu(y)                 (if apply_relu)
         y = log_softmax(y[:valid])  (if apply_log_softmax; padded lanes masked)
    """
    k = pl.program_id(1)

    @pl.when(k == 0)
    def _():
        acc_ref[...] = jnp.zeros_like(acc_ref)

    acc_ref[...] += jnp.dot(a_ref[...], xw_ref[...],
                            preferred_element_type=jnp.float32)

    @pl.when(k == pl.num_programs(1) - 1)
    def _():
        y = acc_ref[...] + shift_ref[...]
        if apply_relu:
            y = jnp.maximum(y, 0.0)
        if apply_log_softmax:
            col = jax.lax.broadcasted_iota(jnp.int32, y.shape, 1)
            y = jnp.where(col < valid_out, y, -1e30)   # mask padded logit lanes
            m = jnp.max(y, axis=-1, keepdims=True)
            lse = jnp.log(jnp.sum(jnp.exp(y - m), axis=-1, keepdims=True))
            y = y - m - lse
        o_ref[...] = y.astype(o_ref.dtype)


def gcn_aggregate(a_bf16, xw_bf16, shift_f32, *, tm, tk, out_dtype,
                  apply_relu, apply_log_softmax, valid_out):
    n_pad = a_bf16.shape[0]
    f_out = xw_bf16.shape[1]
    kernel = functools.partial(agg_kernel,
                               apply_relu=apply_relu,
                               apply_log_softmax=apply_log_softmax,
                               valid_out=valid_out)
    return pl.pallas_call(
        kernel,
        out_shape=jax.ShapeDtypeStruct((n_pad, f_out), out_dtype),
        grid=(n_pad // tm, n_pad // tk),
        in_specs=[
            pl.BlockSpec((tm, tk), lambda i, k: (i, k)),       # A_hat tile
            pl.BlockSpec((tk, f_out), lambda i, k: (k, 0)),    # XW row tile
            pl.BlockSpec((1, f_out), lambda i, k: (0, 0)),     # folded shift
        ],
        out_specs=pl.BlockSpec((tm, f_out), lambda i, k: (i, 0)),
        scratch_shapes=[pltpu.VMEM((tm, f_out), jnp.float32)],
        compiler_params=pltpu.CompilerParams(
            dimension_semantics=("parallel", "arbitrary")),
    )(a_bf16, xw_bf16, shift_f32)


# ------------------------------- JAX glue --------------------------------

def build_norm_adj(edge_index, num_nodes):
    """Dense D^-1/2 (A + I) D^-1/2 from edge_index [2, E] (src -> dst)."""
    src = edge_index[0]
    dst = edge_index[1]
    a = jnp.zeros((num_nodes, num_nodes), jnp.float32)
    a = a.at[dst, src].add(1.0)                       # message flows src -> dst
    a = a + jnp.eye(num_nodes, dtype=jnp.float32)     # self loops
    deg = jnp.sum(a, axis=1)
    d_inv_sqrt = 1.0 / jnp.sqrt(jnp.maximum(deg, 1.0))
    return d_inv_sqrt[:, None] * a * d_inv_sqrt[None, :]


class GCNParams:
    """Deterministic parameter container mirroring the PyTorch module's __init__."""

    def __init__(self, key, num_layers, input_dim, hidden_dim, output_dim):
        self.conv_w = []
        self.conv_b = []
        self.bn_scale = []
        self.bn_shift = []
        eps = 1e-5
        dims = [input_dim] + [hidden_dim] * num_layers
        for i in range(num_layers):
            key, kw = jax.random.split(key)
            fan_in, fan_out = dims[i], dims[i + 1]
            limit = jnp.sqrt(6.0 / (fan_in + fan_out))       # glorot
            self.conv_w.append(
                jax.random.uniform(kw, (fan_in, fan_out), jnp.float32,
                                   minval=-limit, maxval=limit))
            self.conv_b.append(jnp.zeros((1, fan_out), jnp.float32))
            if i < num_layers - 1:
                key, kg, kb = jax.random.split(key, 3)
                gamma = 1.0 + 0.05 * jax.random.normal(kg, (fan_out,), jnp.float32)
                beta = 0.05 * jax.random.normal(kb, (fan_out,), jnp.float32)
                running_mean = jnp.zeros((fan_out,), jnp.float32)
                running_var = jnp.ones((fan_out,), jnp.float32)
                scale = gamma / jnp.sqrt(running_var + eps)
                shift = beta - running_mean * scale
                self.bn_scale.append(scale[None, :])
                self.bn_shift.append(shift[None, :])
        key, kw = jax.random.split(key)
        limit = jnp.sqrt(6.0 / (hidden_dim + output_dim))
        self.final_w = jax.random.uniform(kw, (hidden_dim, output_dim), jnp.float32,
                                          minval=-limit, maxval=limit)
        self.final_b = jnp.zeros((1, output_dim), jnp.float32)
        self.num_layers = num_layers


def gcn_forward(params: GCNParams, x, edge_index, return_embeds=False,
                tm=256, tk=256):
    n = x.shape[0]
    n_pad = _round_up(n, max(tm, tk))

    # A_hat built once, padded + cast to bf16 once, reused by every layer.
    a_hat = build_norm_adj(edge_index, n)
    a_pad = _pad2(a_hat, n_pad, n_pad).astype(jnp.bfloat16)

    f_in_pad = _round_up(x.shape[1], LANE)
    h = _pad2(x.astype(jnp.float32), n_pad, f_in_pad).astype(jnp.bfloat16)

    # Per-layer (W', shift', relu?) with BN scale folded into W and bias into shift.
    layers = []
    for i in range(params.num_layers):
        w, b = params.conv_w[i], params.conv_b[i]
        if i < params.num_layers - 1:
            scale, shift = params.bn_scale[i], params.bn_shift[i]
        else:
            scale = jnp.ones_like(b)
            shift = jnp.zeros_like(b)
        layers.append((w * scale, b * scale + shift, i < params.num_layers - 1))
    layers.append((params.final_w, params.final_b, False))

    out_dim_final = params.final_w.shape[1]
    for idx, (w_f, shift_f, has_relu) in enumerate(layers):
        is_final = idx == len(layers) - 1
        f_in_cur = w_f.shape[0]
        f_out = w_f.shape[1]
        f_in_cur_pad = _round_up(f_in_cur, LANE)
        f_out_pad = _round_up(f_out, LANE)
        w_pad = _pad2(w_f, f_in_cur_pad, f_out_pad).astype(jnp.bfloat16)
        shift_pad = _pad2(shift_f, 1, f_out_pad).astype(jnp.float32)

        xw = xw_matmul(h, w_pad, tm=tm)                # hoisted X @ W'
        h = gcn_aggregate(
            a_pad, xw, shift_pad, tm=tm, tk=tk,
            out_dtype=jnp.float32 if is_final else jnp.bfloat16,
            apply_relu=has_relu,
            apply_log_softmax=is_final and (not return_embeds),
            valid_out=f_out)

    return h[:n, :out_dim_final]


def gcn_reference(params: GCNParams, x, edge_index, return_embeds=False):
    """Pure-JAX f32 reference with identical semantics (eval-mode BN, no dropout)."""
    a = build_norm_adj(edge_index, x.shape[0])
    h = x
    for i in range(params.num_layers):
        h = a @ (h @ params.conv_w[i]) + params.conv_b[i]
        if i < params.num_layers - 1:
            h = h * params.bn_scale[i] + params.bn_shift[i]
            h = jnp.maximum(h, 0.0)
    out = a @ (h @ params.final_w) + params.final_b
    if not return_embeds:
        out = jax.nn.log_softmax(out, axis=-1)
    return out


# --------------------------------- main -----------------------------------

if __name__ == "__main__":
    NUM_LAYERS = 3
    INPUT_DIM = 16
    HIDDEN_DIM = 32
    OUTPUT_DIM = 8
    NUM_NODES = 200      # pads to 256 -> exercises a (2, 2) tiled grid with tm=tk=128
    NUM_EDGES = 800

    key = jax.random.PRNGKey(0)
    key, kx, ke, kp = jax.random.split(key, 4)

    x = jax.random.normal(kx, (NUM_NODES, INPUT_DIM), jnp.float32)
    edge_index = jax.random.randint(ke, (2, NUM_EDGES), 0, NUM_NODES, jnp.int32)

    params = GCNParams(kp, NUM_LAYERS, INPUT_DIM, HIDDEN_DIM, OUTPUT_DIM)

    # Small demo tiles (128) so the tiled accumulator path actually runs multiple grid
    # steps; for large graphs use tm/tk of 256-512.
    out = gcn_forward(params, x, edge_index, return_embeds=False, tm=128, tk=128)
    out = jax.block_until_ready(out)

    assert out.shape == (NUM_NODES, OUTPUT_DIM)

    # log_softmax rows must (approximately) sum to 1 in prob space
    row_sums = jnp.sum(jnp.exp(out), axis=1)
    assert bool(jnp.all(jnp.abs(row_sums - 1.0) < 1e-3)), "row sums off"

    # compare against pure-f32 reference (bf16 matmul operands -> loose tolerance)
    ref = gcn_reference(params, x, edge_index, return_embeds=False)
    max_err = float(jnp.max(jnp.abs(out - ref)))
    assert max_err < 0.2, f"mismatch vs reference: {max_err}"

    print("KERNEL_OK")
</pallas_src>

<mosaic_0001>
module attributes {stable_mosaic.version = 11 : i64} {
  func.func @xw_kernel(%arg0: i32, %arg1: memref<128x128xbf16, #tpu.memory_space<vmem>>, %arg2: memref<128x128xbf16, #tpu.memory_space<vmem>>, %arg3: memref<128x128xbf16, #tpu.memory_space<vmem>>) attributes {dimension_semantics = [#tpu.dimension_semantics<parallel>], iteration_bounds = array<i64: 2>, scalar_prefetch = 0 : i64, scratch_operands = 0 : i64, tpu.core_type = #tpu.core_type<tc>, window_params = [{transform_indices = @transform_0, window_bounds = array<i64: 128, 128>}, {pipeline_mode = #tpu.pipeline_mode<synchronous>, transform_indices = @transform_1, window_bounds = array<i64: 128, 128>}, {transform_indices = @transform_2, window_bounds = array<i64: 128, 128>}]} {
    %c0 = arith.constant 0 : index
    %c0_0 = arith.constant 0 : index
    %0 = vector.load %arg1[%c0, %c0_0] : memref<128x128xbf16, #tpu.memory_space<vmem>>, vector<128x128xbf16>
    %c0_1 = arith.constant 0 : index
    %c0_2 = arith.constant 0 : index
    %1 = vector.load %arg2[%c0_1, %c0_2] : memref<128x128xbf16, #tpu.memory_space<vmem>>, vector<128x128xbf16>
    %cst = arith.constant dense<0.000000e+00> : vector<128x128xf32>
    %2 = tpu.matmul %0, %1, %cst {dimension_numbers = #tpu.dot_dimension_numbers<[1], [0], [0], [1], [0, 0, 1, 1], [], []>} : vector<128x128xbf16>, vector<128x128xbf16>, vector<128x128xf32> -> vector<128x128xf32>
    %3 = arith.truncf %2 : vector<128x128xf32> to vector<128x128xbf16>
    %c0_3 = arith.constant 0 : index
    %c0_4 = arith.constant 0 : index
    %4 = vector.load %arg3[%c0_3, %c0_4] : memref<128x128xbf16, #tpu.memory_space<vmem>>, vector<128x128xbf16>
    tpu.vector_store %arg3[%c0_3, %c0_4], %3 {strides = array<i32>} : memref<128x128xbf16, #tpu.memory_space<vmem>>, vector<128x128xbf16>,
    return
  }
  func.func @transform_0(%arg0: i32) -> (i32, i32) {
    %c0_i32 = arith.constant 0 : i32
    %c0_i32_0 = arith.constant 0 : i32
    return %arg0, %c0_i32 : i32, i32
  }
  func.func @transform_1(%arg0: i32) -> (i32, i32) {
    %c0_i32 = arith.constant 0 : i32
    %c0_i32_0 = arith.constant 0 : i32
    %c0_i32_1 = arith.constant 0 : i32
    return %c0_i32, %c0_i32_0 : i32, i32
  }
  func.func @transform_2(%arg0: i32) -> (i32, i32) {
    %c0_i32 = arith.constant 0 : i32
    %c0_i32_0 = arith.constant 0 : i32
    return %arg0, %c0_i32 : i32, i32
  }
}

</mosaic_0001>

<bundles_post_ra>
// kernel: tpu_custom_call.1
= control target key start
LH: loop header
LB: loop body
LE: loop exit
PB: predicated region body
PF: predicated region fallthrough
CT: control target
= control target key end

     0   :  { %7 = vsyncpa [#allocation3], 0  ;;  %s1179_s0 = inlined_call_operand.hbm [shape: bf16[256,128], index: 0, kind: input, shape index: {}]   ;;  %s1180_s1 = inlined_call_operand.hbm [shape: bf16[128,128], index: 1, kind: input, shape index: {}]   ;;  %s1181_s2 = inlined_call_operand.hbm [shape: bf16[256,128], index: 2, kind: output, shape index: {}]  }
   0x1   :  { %9 = vsyncpa [#allocation3 + $0x1], 0 }
   0x2   :  { %10 = vsyncpa [#allocation6], 0 }
   0x3   :  { %11 = vsyncpa [#allocation4], 0 }
   0x4   :  { %13 = vsyncpa [#allocation4 + $0x1], 0  ;;  %s982_s9 = smov 0   ;;  %s984_s10 = smov 0  }
   0x5   :  { %s986_s11 = smov 0   ;;  %s988_s12 = smov 0  }
   0x6 LB: > { %s1003_s13 = sadd.s32 4294967295, %s958_s12   ;;  %s582_s14 = sadd.s32 4294967294, %s958_s12   ;;  %s958_s12 = sphi %s988_s12, %s1203_s12   ;;  %s954_s11 = sphi %s986_s11, %s1202_s11   ;;  %s950_s10 = sphi %s984_s10, %s1201_s10   ;;  %s946_s9 = sphi %s982_s9, %s1200_s9  }
   0x7   : > { %p39_p0 = scmp.ne.s32.totalorder %s950_s10, %s946_s9  ;;  %p1182_p1 = scmp.eq.s32.totalorder %s1003_s13, 0 }
   0x8   : > { %p90_p3 = scmp.eq.s32.totalorder %s582_s14, 1  ;;  %p583_p5 = scmp.ge.s32.totalorder %s958_s12, 1 }
   0x9   : > { %p1012_p4 = por %p1182_p1, %p39_p0  ;;  %p97_p7 = scmp.lt.s32.totalorder %s958_s12, 3 }
   0xa   : > { %p1017_p6 = por %p90_p3, %p39_p0  ;;  %s960_s18 = smov [#allocation5]  }
   0xb   : > { %s1186_s15 = scalar_select %p1012_p4, 1, 0 }
   0xc   : > { %s1187_s16 = scalar_select %p1017_p6, 1, 0 }
   0xd   : > { %p1022_p8 = pnand %p583_p5, %p97_p7  ;;  %s109_s19 = sshll.u32 %s960_s18, 4  ;;  %s110_s19 = int_to_ptr.vmem [resolvable:$true] %s109_s19 }
   0xe   : > { %s1036_s21 = sadd.s32 1, %s958_s12   ;;  %s26_s22 = sadd.s32 1, %s954_s11 }
   0xf   : > { %s1188_s17 = scalar_select %p1022_p8, 1, 0 }
  0x10   : > { %p767_p9 = pneg %p1022_p8  ;;  %s23_s23 = ssub.s32 %s958_s12, %s1036_s21 }
  0x11   : > { %s847_s24 = scalar_lea.vmem %s110_s19, 1024  ;;  %p855_p5 = scmp.lt.s32.totalorder %s110_s19, %s110_s19 }
  0x12   : > { %p1031_p11 = pnand %p767_p9, %p1182_p1  ;;  %p848_p13 = scmp.ne.s32.totalorder %s110_s19, %s847_s24 }
  0x13   : > { %p856_p7 = scmp.lt.s32.totalorder %s847_s24, %s847_s24 }
  0x14   : > { %p838_p12 = pneg %p1031_p11 }
  0x15   : > { %p857_p10 = por %p856_p7, %p855_p5 }
  0x16   : > { %p850_p0 = pnand %p848_p13, %p838_p12 }
  0x18   : > { %p851_p3 = pneg %p850_p0 }
  0x1a   : > { %p858_p2 = pnand %p857_p10, %p851_p3 }
  0x1c   : > { %861 = shalt.err (!%p858_p2)
}
  0x1d   : > { %s961_s25 = smov 64   ;;  %s962_s26 = smov 4  }
  0x1e   : > { %770 = dma.hbm_to_vmem [thread:$0]  (!%p1031_p11), %s1180_s1, 1024, %s110_s19, [#allocation6], %s961_s25, %s961_s25, %s962_s26  }
  0x1f   : > { %p24_p2 = scmp.eq.s32.totalorder %s23_s23, 0  ;;  %p33_p9 = scmp.ne.s32.totalorder %s954_s11, %s950_s10 }
  0x20   : > { %p34_p10 = scmp.eq.s32.totalorder %s958_s12, 0  ;;  %p780_p12 = scmp.lt.s32.totalorder %s958_s12, 2 }
  0x21   : > { %s1056_s29 = scalar_select %p24_p2, %s954_s11, %s26_s22  }
  0x22   : > { %p35_p13 = por %p34_p10, %p33_p9  ;;  %p1190_p0 = scmp.eq.s32.totalorder %s1003_s13, 1 }
  0x23   : > { %s123_s3 = sand.u32 1, %s954_s11   ;;  %s630_s4 = sshll.u32 %s958_s12, 10 }
  0x24   : > { %p1060_p3 = por %p1190_p0, %p33_p9  ;;  %s586_s5 = sshll.u32 %s123_s3, 6 }
  0x25   : > { %s1069_s8 = scalar_lea.hbm %s1179_s0, %s630_s4  ;;  %s127_s14 = scalar_lea.vmem [#allocation2], %s586_s5 }
  0x26   : > { %s1191_s30 = scalar_select %p1060_p3, 1, 0 }
  0x27   : > { %s134_s18 = sshll.u32 %s127_s14, 4  ;;  %p1071_p11 = pnand %p780_p12, %p35_p13  ;;  %s1075_s18 = int_to_ptr.vmem [resolvable:$true] %s134_s18 }
  0x28   : > { %s1077_s20 = scalar_lea.sflag [#allocation3], %s123_s3  ;;  %s862_s22 = scalar_lea.hbm %s1069_s8, 1024 }
  0x29   : > { %p863_p5 = scmp.ne.s32.totalorder %s1069_s8, %s862_s22  ;;  %p864_p7 = pneg %p1071_p11 }
  0x2a   : > { %s867_s27 = scalar_lea.hbm %s1179_s0, 2048  ;;  %p868_p10 = scmp.lt.s32.totalorder %s1069_s8, %s1179_s0 }
  0x2b   : > { %p865_p2 = pnand %p864_p7, %p863_p5  ;;  %p869_p12 = scmp.lt.s32.totalorder %s867_s27, %s862_s22 }
  0x2d   : > { %p866_p9 = pneg %p865_p2  ;;  %p870_p13 = por %p869_p12, %p868_p10 }
  0x2f   : > { %p871_p0 = pnand %p870_p13, %p866_p9 }
  0x31   : > { %874 = shalt.err (!%p871_p0)
}
  0x32   : > { %s875_s3 = scalar_lea.vmem %s1075_s18, 1024  ;;  %s963_s5 = smov [#allocation2]  }
  0x33   : > { %p876_p1 = scmp.ne.s32.totalorder %s1075_s18, %s875_s3  ;;  %s880_s6 = sshll.u32 %s963_s5, 4  ;;  %s881_s6 = int_to_ptr.vmem [resolvable:$false] %s880_s6 }
  0x34   : > { %s882_s7 = scalar_lea.vmem %s881_s6, 2048  ;;  %p883_p2 = scmp.lt.s32.totalorder %s1075_s18, %s881_s6 }
  0x35   : > { %p878_p6 = pnand %p876_p1, %p864_p7  ;;  %p884_p3 = scmp.lt.s32.totalorder %s882_s7, %s875_s3 }
  0x37   : > { %p879_p5 = pneg %p878_p6  ;;  %p885_p4 = por %p884_p3, %p883_p2 }
  0x39   : > { %p886_p8 = pnand %p885_p4, %p879_p5 }
  0x3b   : > { %889 = shalt.err (!%p886_p8)
}
  0x3c   : > { %774 = dma.hbm_to_vmem [thread:$0]  (!%p1071_p11), %s1069_s8, 1024, %s1075_s18, %s1077_s20, %s961_s25, %s961_s25, %s962_s26  }
  0x3d   : > { %p1193_p1 = scmp.ne.s32.totalorder %s1188_s17, 0 }
  0x3e   : > { %s1104_s14 = sand.u32 (!%p1193_p1), 1, %s950_s10   ;;  %p1194_p4 = scmp.ne.s32.totalorder (!%p1193_p1), %s1186_s15, 0 }
  0x3f   : > { %146 = sbr.rel (%p1193_p1) target bundleno = 328 (0x148), region = 28  ;;  %s590_s22 = sshll.u32 (!%p1193_p1), %s1104_s14, 6 }
  0x40   : > { %s149_s23 = scalar_lea.sflag (!%p1193_p1), [#allocation3], %s1104_s14  ;;  %s1110_s19 = scalar_lea.vmem (!%p1193_p1), [#allocation2], %s590_s22 }
  0x44   : > { %933 = dma.done.wait (%p1194_p4), %s149_s23, 1024  }
  0x45   : > { %935 = vsyncadd (%p1194_p4), %s149_s23, 4294966272  ;;  %p1195_p6 = scmp.eq.s32.totalorder %s1003_s13, 0 }
  0x47   : > { %937 = dma.done.wait (%p1195_p6), [#allocation6], 1024   ;;  %p1196_p8 = pmov %p1195_p6 }
  0x48   : > { %v820_v0 = vld [vmem:[#allocation5 + $0x38] sm:$0xff]   ;;  %v821_v1 = vld [vmem:[#allocation5 + $0x30] sm:$0xff]   ;;  %v822_v2 = vld [vmem:[#allocation5 + $0x28] sm:$0xff]   ;;  %s176_s15 = scalar_lea.vmem [#allocation7], %s590_s22  ;;  %s647_s25 = sshll.u32 %s1003_s13, 10 }
  0x49   : > { %939 = vsyncadd (%p1196_p8), [#allocation6], 4294966272  ;;  %711 = vmatprep.subr.bf16.mxu0 %v820_v0  ;;  %743 = vmatprep.subr.bf16.mxu1 %v820_v0  ;;  %v823_v3 = vld [vmem:[#allocation5 + $0x20] sm:$0xff]   ;;  %v824_v6 = vld [vmem:[#allocation5 + $0x18] sm:$0xff]   ;;  %s499_s17 = sshll.u32 %s176_s15, 4  ;;  %s1136_s18 = scalar_lea.hbm %s1181_s2, %s647_s25  ;;  %s1131_s17 = int_to_ptr.vmem [resolvable:$true] %s499_s17 }
  0x4a   : > { %712 = vmatpush3.bf16.msra.mxu0 %v820_v0  ;;  %751 = vmatpush3.bf16.msra.mxu1 %v820_v0  ;;  %v828_v4 = vld [vmem:[%s1110_s19] sm:$0xff]   ;;  %v825_v7 = vld [vmem:[#allocation5 + $0x10] sm:$0xff]   ;;  %v826_v8 = vld [vmem:[#allocation5 + $0x8] sm:$0xff]   ;;  %s486_s13 = scalar_lea.sflag [#allocation4], %s1104_s14  ;;  %s890_s20 = scalar_lea.vmem %s1131_s17, 1024 }
  0x4b   : > { %713 = vmatprep.subr.bf16.mxu0 %v821_v1  ;;  %744 = vmatprep.subr.bf16.mxu1 %v821_v1  ;;  %v829_v5 = vld [vmem:[%s1110_s19 + $0x20] sm:$0xff]   ;;  %v830_v10 = vld [vmem:[%s1110_s19 + $0x8] sm:$0xff]   ;;  %v832_v12 = vld [vmem:[%s1110_s19 + $0x10] sm:$0xff]   ;;  %p891_p3 = scmp.ne.s32.totalorder %s1131_s17, %s890_s20  ;;  %p1197_p11 = scmp.ne.s32.totalorder %s1191_s30, 0 }
  0x4c   : > { %727 = vmatprep.mubr.bf16.mxu0 %v828_v4  ;;  %735 = vmatprep.mubr.bf16.mxu1 %v829_v5  ;;  %v827_v9 = vld [vmem:[#allocation5] sm:$0xff]   ;;  %v831_v11 = vld [vmem:[%s1110_s19 + $0x28] sm:$0xff]   ;;  %v833_v13 = vld [vmem:[%s1110_s19 + $0x30] sm:$0xff]   ;;  %s964_s24 = smov [#allocation7]  }
  0x4d   : > { %v834_v14 = vld [vmem:[%s1110_s19 + $0x18] sm:$0xff]   ;;  %p892_p7 = pnand %p891_p3, %p1197_p11  ;;  %s894_s27 = sshll.u32 %s964_s24, 4  ;;  %s895_s27 = int_to_ptr.vmem [resolvable:$false] %s894_s27 }
  0x4e   : > { %714 = vmatpush3.bf16.msra.mxu0 %v821_v1  ;;  %752 = vmatpush3.bf16.msra.mxu1 %v821_v1  ;;  %v835_v15 = vld [vmem:[%s1110_s19 + $0x38] sm:$0xff]   ;;  %s896_s28 = scalar_lea.vmem %s895_s27, 2048  ;;  %p897_p10 = scmp.lt.s32.totalorder %s1131_s17, %s895_s27 }
  0x4f   : > { %715 = vmatprep.subr.bf16.mxu0 %v822_v2  ;;  %745 = vmatprep.subr.bf16.mxu1 %v822_v2  ;;  %p893_p9 = pneg %p892_p7  ;;  %p898_p12 = scmp.lt.s32.totalorder %s896_s28, %s890_s20 }
  0x51   : > { %p899_p13 = por %p898_p12, %p897_p10 }
  0x52   : > { %716 = vmatpush3.bf16.msra.mxu0 %v822_v2  ;;  %753 = vmatpush3.bf16.msra.mxu1 %v822_v2 }
  0x53   : > { %717 = vmatprep.subr.bf16.mxu0 %v823_v3  ;;  %746 = vmatprep.subr.bf16.mxu1 %v823_v3  ;;  %p900_p0 = pnand %p899_p13, %p893_p9 }
  0x56   : > { %718 = vmatpush3.bf16.msra.mxu0 %v823_v3  ;;  %754 = vmatpush3.bf16.msra.mxu1 %v823_v3 }
  0x57   : > { %719 = vmatprep.subr.bf16.mxu0 %v824_v6  ;;  %747 = vmatprep.subr.bf16.mxu1 %v824_v6 }
  0x5a   : > { %720 = vmatpush3.bf16.msra.mxu0 %v824_v6  ;;  %755 = vmatpush3.bf16.msra.mxu1 %v824_v6 }
  0x5b   : > { %721 = vmatprep.subr.bf16.mxu0 %v825_v7  ;;  %748 = vmatprep.subr.bf16.mxu1 %v825_v7 }
  0x5e   : > { %722 = vmatpush3.bf16.msra.mxu0 %v825_v7  ;;  %756 = vmatpush3.bf16.msra.mxu1 %v825_v7 }
  0x5f   : > { %723 = vmatprep.subr.bf16.mxu0 %v826_v8  ;;  %749 = vmatprep.subr.bf16.mxu1 %v826_v8 }
  0x62   : > { %724 = vmatpush3.bf16.msra.mxu0 %v826_v8  ;;  %757 = vmatpush3.bf16.msra.mxu1 %v826_v8 }
  0x63   : > { %725 = vmatprep.subr.bf16.mxu0 %v827_v9  ;;  %750 = vmatprep.subr.bf16.mxu1 %v827_v9 }
  0x66   : > { %726 = vmatpush3.bf16.msra.mxu0 %v827_v9  ;;  %758 = vmatpush3.bf16.msra.mxu1 %v827_v9 }
  0x69   : > { %728 = vmatmul.mubr.bf16.vlgmr.msra.gmra.mxu0 %v830_v10  ;;  %736 = vmatmul.mubr.bf16.vlgmr.msra.gmra.mxu1 %v831_v11 }
  0x6a   : > { %731 = vmatprep.mubr.bf16.mxu0 %v832_v12  ;;  %739 = vmatprep.mubr.bf16.mxu1 %v833_v13 }
  0x71   : > { %732 = vmatmul.mubr.bf16.gmra.mxu0 %v834_v14  ;;  %740 = vmatmul.mubr.bf16.gmra.mxu1 %v835_v15 }
 0x129   : > { %v729_v16 = vpop.f32.mrf.mxu0  ;;  %v737_v17 = vpop.f32.mrf.mxu1 }
 0x12b   : > { %v342_v18 = vpop.f32.mrf.mxu0  ;;  %v374_v19 = vpop.f32.mrf.mxu1 }
 0x12d   : > { %v730_v20 = vpop.f32.mrf.mxu0  ;;  %v738_v21 = vpop.f32.mrf.mxu1 }
 0x12e   : > { %v656_v22 = vpack.c.bf16 %v730_v20, %v729_v16  ;;  %v676_v23 = vpack.c.bf16 %v738_v21, %v737_v17 }
 0x12f   : > { %v345_v24 = vpop.f32.mrf.mxu0  ;;  %v377_v25 = vpop.f32.mrf.mxu1 }
 0x130   : > { %688 = vst [vmem:[%s176_s15 + $0x8] sm:$0xff] %v656_v22   ;;  %692 = vst [vmem:[%s176_s15 + $0x28] sm:$0xff] %v676_v23   ;;  %v651_v26 = vpack.c.bf16 %v345_v24, %v342_v18  ;;  %v671_v27 = vpack.c.bf16 %v377_v25, %v374_v19 }
 0x131   : > { %v733_v28 = vpop.f32.mrf.mxu0  ;;  %v741_v29 = vpop.f32.mrf.mxu1 }
 0x132   : > { %652 = vst [vmem:[%s176_s15] sm:$0xff] %v651_v26   ;;  %691 = vst [vmem:[%s176_s15 + $0x20] sm:$0xff] %v671_v27  }
 0x133   : > { %v358_v30 = vpop.f32.mrf.mxu0  ;;  %v390_v31 = vpop.f32.mrf.mxu1 }
 0x135   : > { %v734_v32 = vpop.f32.mrf.mxu0  ;;  %v742_v33 = vpop.f32.mrf.mxu1 }
 0x136   : > { %v666_v34 = vpack.c.bf16 %v734_v32, %v733_v28  ;;  %v686_v35 = vpack.c.bf16 %v742_v33, %v741_v29 }
 0x137   : > { %v361_v36 = vpop.f32.mrf.mxu0  ;;  %v393_v37 = vpop.f32.mrf.mxu1 }
 0x138   : > { %690 = vst [vmem:[%s176_s15 + $0x18] sm:$0xff] %v666_v34   ;;  %694 = vst [vmem:[%s176_s15 + $0x38] sm:$0xff] %v686_v35   ;;  %v661_v38 = vpack.c.bf16 %v361_v36, %v358_v30  ;;  %v681_v39 = vpack.c.bf16 %v393_v37, %v390_v31 }
 0x13a   : > { %689 = vst [vmem:[%s176_s15 + $0x10] sm:$0xff] %v661_v38   ;;  %693 = vst [vmem:[%s176_s15 + $0x30] sm:$0xff] %v681_v39  }
 0x13b   : > { %903 = shalt.err (!%p900_p0)
}
 0x13c   : > { %s904_s4 = scalar_lea.hbm %s1136_s18, 1024  ;;  %s908_s6 = scalar_lea.hbm %s1181_s2, 2048 }
 0x13d   : > { %p905_p5 = scmp.ne.s32.totalorder %s1136_s18, %s904_s4  ;;  %p909_p4 = scmp.lt.s32.totalorder %s1136_s18, %s1181_s2 }
 0x13e   : > { %p910_p6 = scmp.lt.s32.totalorder %s908_s6, %s904_s4 }
 0x13f   : > { %p906_p2 = pnand %p905_p5, %p1197_p11 }
 0x140   : > { %p911_p8 = por %p910_p6, %p909_p4 }
 0x141   : > { %p907_p1 = pneg %p906_p2 }
 0x143   : > { %p912_p3 = pnand %p911_p8, %p907_p1 }
 0x145   : > { %915 = shalt.err (!%p912_p3)
}
 0x146   : > { %s965_s23 = smov 64   ;;  %s966_s19 = smov 4  }
 0x147   : > { %765 = dma.vmem_to_hbm [thread:$0]  (%p1197_p11), %s1131_s17, 1024, %s1136_s18, %s486_s13, %s965_s23, %s965_s23, %s966_s19  }
 0x148 PF: > { %s514_s15 = sand.u32 1, %s946_s9   ;;  %p1198_p7 = scmp.ne.s32.totalorder %s1187_s16, 0 }
 0x149   : > { %p1199_p9 = scmp.ge.s32.totalorder %s958_s12, 2  ;;  %s515_s25 = scalar_lea.sflag [#allocation4], %s514_s15 }
 0x14b   : > { %p776_p10 = pnand %p1199_p9, %p1198_p7 }
 0x14d   : > { %p777_p12 = pneg %p776_p10 }
 0x14f   : > { %941 = dma.done.wait (%p777_p12), %s515_s25, 1024  }
 0x150   : > { %943 = vsyncadd (%p777_p12), %s515_s25, 4294966272  ;;  %p16_p13 = scmp.ge.s32.totalorder %s1036_s21, 4   ;;  %s1200_s9 = smov %s950_s10 }
 0x151   : > { %s1201_s10 = smov %s954_s11  ;;  %s1202_s11 = smov %s1056_s29 }
 0x152   : > { %s1203_s12 = smov %s1036_s21  ;;  %18 = sbr.rel (!%p16_p13) target bundleno = 6 (0x6), region = 77 }
 0x157   :  { %520 = vsyncpa [#allocation3], 1 }
 0x158   :  { %522 = vsyncpa [#allocation3 + $0x1], 1 }
 0x159   :  { %523 = vsyncpa [#allocation6], 1 }
 0x15a   :  { %524 = vsyncpa [#allocation4], 1 }
 0x15b   :  { %526 = vsyncpa [#allocation4 + $0x1], 1 }

</bundles_post_ra>
